<compile_context>
chip_gen: v7x
topology: tpu7x:2x2x1
jax: 0.10.0
libtpu: 0.0.40
codegen_flags: <defaults>
</compile_context>

<pallas_src>
import jax
import jax.numpy as jnp
from jax import lax
from jax.experimental import pallas as pl
from jax.experimental.pallas import tpu as pltpu

MI_LOSS_WEIGHT = 0.0005   # MutualLoss.__init__ default
_EPS = 1e-4


# ----------------------------------------------------------------------------
# Hardware-aware budgets.
# ----------------------------------------------------------------------------
def _vmem_capacity_bytes():
    try:
        return int(pltpu.get_tpu_info().vmem_capacity_bytes)
    except Exception:
        return 64 << 20          # conservative fallback (v7x per-TC VMEM)


def _round_up(x, m):
    return (x + m - 1) // m * m


def _pick_tile_rows(r, c, itemsize, per_iter_budget):
    """Largest multiple-of-8 row tile whose per-iteration working set
    (double-buffered native x tile + ~3 f32 temporaries) fits the budget."""
    r8 = _round_up(max(r, 1), 8)
    bytes_per_row = c * (2 * itemsize + 3 * 4)
    tr = max(8, (per_iter_budget // max(bytes_per_row, 1)) // 8 * 8)
    return int(min(tr, r8, 8192))


# ----------------------------------------------------------------------------
# Path A: resident streaming path (single HBM read, pipelined).
# ----------------------------------------------------------------------------
def _make_resident_kernel(r, c, tr, nr):
    rem = r % tr
    r_pad = nr * tr

    def kernel(x_ref, o_ref, xbuf, rowsum, colsum, mn_ref, mx_ref):
        i = pl.program_id(0)
        row0 = pl.multiple_of(i * tr, 8)
        x = x_ref[...].astype(jnp.float32)                       # (tr, c)

        if rem:  # mask rows past R (only the last tile is actually ragged)
            m = (lax.broadcasted_iota(jnp.int32, (tr, c), 0) + row0) < r
            x_sum = jnp.where(m, x, 0.0)
            x_min = jnp.where(m, x, jnp.inf)
            x_max = jnp.where(m, x, -jnp.inf)
        else:
            x_sum = x_min = x_max = x

        # Stream the raw tile into the resident f32 copy + raw row sums.
        xbuf[pl.ds(row0, tr), :] = x
        rowsum[pl.ds(row0, tr), :] = jnp.sum(x_sum, axis=1, keepdims=True)

        tile_colsum = jnp.sum(x_sum, axis=0, keepdims=True)
        tile_mn = jnp.min(jnp.min(x_min, axis=1, keepdims=True), axis=0, keepdims=True)
        tile_mx = jnp.max(jnp.max(x_max, axis=1, keepdims=True), axis=0, keepdims=True)

        @pl.when(i == 0)
        def _():
            colsum[...] = tile_colsum
            mn_ref[...] = tile_mn
            mx_ref[...] = tile_mx

        @pl.when(i != 0)
        def _():
            colsum[...] += tile_colsum
            mn_ref[...] = jnp.minimum(mn_ref[...], tile_mn)
            mx_ref[...] = jnp.maximum(mx_ref[...], tile_mx)

        @pl.when(i == nr - 1)
        def _finalize():
            mn = mn_ref[...]                                     # (1, 1)
            inv_range = 1.0 / (mx_ref[...] - mn)                 # (1, 1)

            # TI marginal: rowsum(xs) derived algebraically from raw rowsum.
            p_ti = (rowsum[...] - c * mn) * inv_range + _EPS     # (r_pad, 1)
            if rem:
                rm = lax.broadcasted_iota(jnp.int32, (r_pad, 1), 0) < r
                ti_max = jnp.max(jnp.where(rm, p_ti, -jnp.inf), axis=0, keepdims=True)
                ti_exp = jnp.where(rm, jnp.exp(p_ti - ti_max), 0.0)
            else:
                ti_max = jnp.max(p_ti, axis=0, keepdims=True)
                ti_exp = jnp.exp(p_ti - ti_max)
            # 1 / softmax(P_TI); padded rows -> inf but are masked in the loss.
            rowsum[...] = jnp.sum(ti_exp, axis=0, keepdims=True) * pl.reciprocal(ti_exp)

            # EI marginal.
            p_ei = (colsum[...] - r * mn) * inv_range + _EPS     # (1, c)
            ei_exp = jnp.exp(p_ei - jnp.max(p_ei, axis=1, keepdims=True))
            colsum[...] = jnp.sum(ei_exp, axis=1, keepdims=True) * pl.reciprocal(ei_exp)

            # Loss over the resident VMEM copy, in row chunks (no second HBM read).
            def chunk(j, acc):
                r0 = pl.multiple_of(j * tr, 8)
                xs = (xbuf[pl.ds(r0, tr), :] - mn) * inv_range
                term = xs * jnp.log(xs * rowsum[pl.ds(r0, tr), :] * colsum[...] + _EPS)
                if rem:
                    mm = (lax.broadcasted_iota(jnp.int32, (tr, c), 0) + r0) < r
                    term = jnp.where(mm, term, 0.0)
                return acc + jnp.sum(jnp.sum(term, axis=1, keepdims=True),
                                     axis=0, keepdims=True)

            total = lax.fori_loop(0, nr, chunk, jnp.zeros((1, 1), jnp.float32))
            o_ref[...] = -total

    return kernel


def _mutual_loss_resident(x, tile_rows, vmem_limit):
    r, c = x.shape
    tr = int(tile_rows)
    nr = pl.cdiv(r, tr)
    r_pad = nr * tr
    kernel = _make_resident_kernel(r, c, tr, nr)
    out = pl.pallas_call(
        kernel,
        grid=(nr,),
        in_specs=[pl.BlockSpec((tr, c), lambda i: (i, 0))],       # native dtype tile
        out_shape=jax.ShapeDtypeStruct((1, 1), jnp.float32),
        out_specs=pl.BlockSpec((1, 1), lambda i: (0, 0)),
        scratch_shapes=[
            pltpu.VMEM((r_pad, c), jnp.float32),    # resident f32 copy of x
            pltpu.VMEM((r_pad, 1), jnp.float32),    # raw row sums -> 1/P_TI
            pltpu.VMEM((1, c), jnp.float32),        # raw col sums -> 1/P_EI
            pltpu.VMEM((1, 1), jnp.float32),        # running min
            pltpu.VMEM((1, 1), jnp.float32),        # running max
        ],
        compiler_params=pltpu.CompilerParams(
            dimension_semantics=("arbitrary",),
            vmem_limit_bytes=int(vmem_limit)),
    )(x)
    return out[0, 0]


# ----------------------------------------------------------------------------
# Path B: fused two-phase streaming path (large matrices; 2x HBM read of x).
# ----------------------------------------------------------------------------
def _make_twophase_kernel(r, c, tr, nr):
    rem = r % tr
    r_pad = nr * tr

    def kernel(x_ref, o_ref, rowsum, colsum, mn_ref, mx_ref, invr_ref, acc_ref):
        p = pl.program_id(0)      # 0 = stats phase, 1 = loss phase
        i = pl.program_id(1)      # row-tile index
        row0 = pl.multiple_of(i * tr, 8)

        # ---- phase 0: streaming raw stats ----
        @pl.when(p == 0)
        def _stats():
            x = x_ref[...].astype(jnp.float32)
            if rem:
                m = (lax.broadcasted_iota(jnp.int32, (tr, c), 0) + row0) < r
                x_sum = jnp.where(m, x, 0.0)
                x_min = jnp.where(m, x, jnp.inf)
                x_max = jnp.where(m, x, -jnp.inf)
            else:
                x_sum = x_min = x_max = x

            rowsum[pl.ds(row0, tr), :] = jnp.sum(x_sum, axis=1, keepdims=True)
            tile_colsum = jnp.sum(x_sum, axis=0, keepdims=True)
            tile_mn = jnp.min(jnp.min(x_min, axis=1, keepdims=True), axis=0, keepdims=True)
            tile_mx = jnp.max(jnp.max(x_max, axis=1, keepdims=True), axis=0, keepdims=True)

            @pl.when(i == 0)
            def _():
                colsum[...] = tile_colsum
                mn_ref[...] = tile_mn
                mx_ref[...] = tile_mx

            @pl.when(i != 0)
            def _():
                colsum[...] += tile_colsum
                mn_ref[...] = jnp.minimum(mn_ref[...], tile_mn)
                mx_ref[...] = jnp.maximum(mx_ref[...], tile_mx)

        # ---- phase boundary: marginals (softmax + reciprocals), in-kernel ----
        @pl.when((p == 1) & (i == 0))
        def _marginals():
            mn = mn_ref[...]
            inv_range = 1.0 / (mx_ref[...] - mn)
            invr_ref[...] = inv_range

            p_ti = (rowsum[...] - c * mn) * inv_range + _EPS
            if rem:
                rm = lax.broadcasted_iota(jnp.int32, (r_pad, 1), 0) < r
                ti_max = jnp.max(jnp.where(rm, p_ti, -jnp.inf), axis=0, keepdims=True)
                ti_exp = jnp.where(rm, jnp.exp(p_ti - ti_max), 0.0)
            else:
                ti_max = jnp.max(p_ti, axis=0, keepdims=True)
                ti_exp = jnp.exp(p_ti - ti_max)
            rowsum[...] = jnp.sum(ti_exp, axis=0, keepdims=True) * pl.reciprocal(ti_exp)

            p_ei = (colsum[...] - r * mn) * inv_range + _EPS
            ei_exp = jnp.exp(p_ei - jnp.max(p_ei, axis=1, keepdims=True))
            colsum[...] = jnp.sum(ei_exp, axis=1, keepdims=True) * pl.reciprocal(ei_exp)

            acc_ref[...] = jnp.zeros_like(acc_ref)

        # ---- phase 1: loss accumulation over re-streamed x tiles ----
        @pl.when(p == 1)
        def _loss():
            mn = mn_ref[...]
            inv_range = invr_ref[...]
            x = x_ref[...].astype(jnp.float32)
            xs = (x - mn) * inv_range
            term = xs * jnp.log(xs * rowsum[pl.ds(row0, tr), :] * colsum[...] + _EPS)
            if rem:
                m = (lax.broadcasted_iota(jnp.int32, (tr, c), 0) + row0) < r
                term = jnp.where(m, term, 0.0)
            acc_ref[...] += jnp.sum(jnp.sum(term, axis=1, keepdims=True),
                                    axis=0, keepdims=True)

        @pl.when((p == 1) & (i == nr - 1))
        def _write_out():
            o_ref[...] = -acc_ref[...]

    return kernel


def _mutual_loss_twophase(x, tile_rows, vmem_limit):
    r, c = x.shape
    tr = int(tile_rows)
    nr = pl.cdiv(r, tr)
    r_pad = nr * tr
    kernel = _make_twophase_kernel(r, c, tr, nr)
    out = pl.pallas_call(
        kernel,
        grid=(2, nr),             # axis 0: phase (stats, loss); axis 1: row tiles
        in_specs=[pl.BlockSpec((tr, c), lambda p, i: (i, 0))],    # native dtype tile
        out_shape=jax.ShapeDtypeStruct((1, 1), jnp.float32),
        out_specs=pl.BlockSpec((1, 1), lambda p, i: (0, 0)),
        scratch_shapes=[
            pltpu.VMEM((r_pad, 1), jnp.float32),   # raw row sums -> 1/P_TI
            pltpu.VMEM((1, c), jnp.float32),       # raw col sums -> 1/P_EI
            pltpu.VMEM((1, 1), jnp.float32),       # global min
            pltpu.VMEM((1, 1), jnp.float32),       # global max
            pltpu.VMEM((1, 1), jnp.float32),       # 1 / (max - min)
            pltpu.VMEM((1, 1), jnp.float32),       # loss accumulator
        ],
        compiler_params=pltpu.CompilerParams(
            dimension_semantics=("arbitrary", "arbitrary"),
            vmem_limit_bytes=int(vmem_limit)),
    )(x)
    return out[0, 0]


# ----------------------------------------------------------------------------
# Public wrapper (== MutualLoss.forward).
# ----------------------------------------------------------------------------
def mutual_loss_pallas(total_mutual_mat, mi_loss_weight=MI_LOSS_WEIGHT):
    """Weighted mutual loss of a 2D mutual matrix (text-token x entity-token)."""
    assert total_mutual_mat.ndim == 2, total_mutual_mat.shape
    r, c = total_mutual_mat.shape
    itemsize = total_mutual_mat.dtype.itemsize

    phys = _vmem_capacity_bytes()                    # 128 MiB v5e/v6e, 64 MiB v7x
    vmem_limit = (3 * phys) // 4                     # ~96 MiB / ~48 MiB, with headroom
    r8 = _round_up(max(r, 1), 8)

    # Resident path if the f32 copy (+ rowsum scratch padding) fits ~1/4 of VMEM.
    resident_bytes = r8 * c * 4 + r8 * 512
    if resident_bytes <= phys // 4:
        tr = _pick_tile_rows(r, c, itemsize, phys // 4)
        raw = _mutual_loss_resident(total_mutual_mat, tile_rows=tr,
                                    vmem_limit=vmem_limit)
    else:
        tr = _pick_tile_rows(r, c, itemsize, phys // 2)
        raw = _mutual_loss_twophase(total_mutual_mat, tile_rows=tr,
                                    vmem_limit=vmem_limit)
    return jnp.float32(mi_loss_weight) * raw


# ----------------------------------------------------------------------------
# Pure-JAX reference mirroring the PyTorch module (for sanity checking).
# ----------------------------------------------------------------------------
def _mutual_loss_ref(x, mi_loss_weight=MI_LOSS_WEIGHT):
    x = x.astype(jnp.float32)
    xs = (x - x.min()) / (x.max() - x.min())
    p_ti = jnp.sum(xs, axis=1, keepdims=True) + _EPS
    p_ei = jnp.sum(xs, axis=0, keepdims=True) + _EPS
    p_ti = jax.nn.softmax(p_ti, axis=0)
    p_ei = jax.nn.softmax(p_ei, axis=1)
    return mi_loss_weight * (-(xs * jnp.log(xs / p_ti / p_ei + _EPS)).sum())


if __name__ == "__main__":
    key = jax.random.PRNGKey(0)
    k1, k2, k3, k4, k5 = jax.random.split(key, 5)
    vmem_limit = (3 * _vmem_capacity_bytes()) // 4

    def check(name, got, want, rtol):
        got = jax.block_until_ready(got)
        assert jnp.allclose(got, want, rtol=rtol, atol=1e-6), (name, got, want)

    # 1) Small f32 mutual matrix -> resident single-read path.
    x1 = jax.random.uniform(k1, (16, 128), dtype=jnp.float32)
    check("f32_resident", mutual_loss_pallas(x1), _mutual_loss_ref(x1), 2e-5)

    # 2) bf16 input: DMA'd in the native dtype, cast to f32 inside the kernel.
    x2 = jax.random.uniform(k2, (16, 128), dtype=jnp.float32).astype(jnp.bfloat16)
    check("bf16_resident", mutual_loss_pallas(x2), _mutual_loss_ref(x2), 2e-5)

    # 3) Ragged row count (R not a multiple of 8) -> masked tile, resident path.
    x3 = jax.random.uniform(k3, (41, 128), dtype=jnp.float32)
    check("ragged_resident", mutual_loss_pallas(x3), _mutual_loss_ref(x3), 1e-4)

    # 4) Multi-tile resident streaming (several row tiles into the VMEM copy).
    x4 = jax.random.uniform(k4, (64, 128), dtype=jnp.float32)
    loss4 = jnp.float32(MI_LOSS_WEIGHT) * _mutual_loss_resident(
        x4, tile_rows=16, vmem_limit=vmem_limit)
    check("resident_multitile", loss4, _mutual_loss_ref(x4), 1e-4)

    # 5) Force the fused two-phase (large-matrix) path at a small shape,
    #    including a masked ragged last tile (41 % 16 != 0).
    x5 = jax.random.uniform(k5, (41, 256), dtype=jnp.float32)
    loss5 = jnp.float32(MI_LOSS_WEIGHT) * _mutual_loss_twophase(
        x5, tile_rows=16, vmem_limit=vmem_limit)
    check("twophase", loss5, _mutual_loss_ref(x5), 1e-4)

    print("KERNEL_OK")
</pallas_src>

<mosaic_0001>
module attributes {stable_mosaic.version = 11 : i64} {
  func.func @kernel(%arg0: i32, %arg1: memref<16x128xf32, #tpu.memory_space<vmem>>, %arg2: memref<1x1xf32, #tpu.memory_space<vmem>>, %arg3: memref<16x128xf32, #tpu.memory_space<vmem>>, %arg4: memref<16x1xf32, #tpu.memory_space<vmem>>, %arg5: memref<1x128xf32, #tpu.memory_space<vmem>>, %arg6: memref<1x1xf32, #tpu.memory_space<vmem>>, %arg7: memref<1x1xf32, #tpu.memory_space<vmem>>) attributes {dimension_semantics = [#tpu.dimension_semantics<arbitrary>], iteration_bounds = array<i64: 1>, scalar_prefetch = 0 : i64, scratch_operands = 5 : i64, tpu.core_type = #tpu.core_type<tc>, window_params = [{transform_indices = @transform_0, window_bounds = array<i64: 16, 128>}, {pipeline_mode = #tpu.pipeline_mode<synchronous>, transform_indices = @transform_1, window_bounds = array<i64: 1, 1>}]} {
    %c16_i32 = arith.constant 16 : i32
    %0 = arith.muli %arg0, %c16_i32 : i32
    %1 = tpu.assume_multiple %0, 8 : i32
    %c0 = arith.constant 0 : index
    %c0_0 = arith.constant 0 : index
    %2 = vector.load %arg1[%c0, %c0_0] : memref<16x128xf32, #tpu.memory_space<vmem>>, vector<16x128xf32>
    %3 = arith.index_cast %1 : i32 to index
    %c0_1 = arith.constant 0 : index
    %4 = vector.load %arg3[%3, %c0_1] : memref<16x128xf32, #tpu.memory_space<vmem>>, vector<16x128xf32>
    tpu.vector_store %arg3[%3, %c0_1], %2 {strides = array<i32>} : memref<16x128xf32, #tpu.memory_space<vmem>>, vector<16x128xf32>,
    %cst = arith.constant dense<0.000000e+00> : vector<16xf32>
    %5 = vector.multi_reduction <add>, %2, %cst [1] : vector<16x128xf32> to vector<16xf32>
    %6 = vector.shape_cast %5 : vector<16xf32> to vector<16x1xf32>
    %7 = arith.index_cast %1 : i32 to index
    %c0_2 = arith.constant 0 : index
    %8 = vector.load %arg4[%7, %c0_2] : memref<16x1xf32, #tpu.memory_space<vmem>>, vector<16x1xf32>
    tpu.vector_store %arg4[%7, %c0_2], %6 {strides = array<i32>} : memref<16x1xf32, #tpu.memory_space<vmem>>, vector<16x1xf32>,
    %cst_3 = arith.constant dense<0.000000e+00> : vector<128xf32>
    %9 = vector.multi_reduction <add>, %2, %cst_3 [0] : vector<16x128xf32> to vector<128xf32>
    %10 = vector.shape_cast %9 : vector<128xf32> to vector<1x128xf32>
    %cst_4 = arith.constant dense<0x7F800000> : vector<16xf32>
    %11 = vector.multi_reduction <minimumf>, %2, %cst_4 [1] : vector<16x128xf32> to vector<16xf32>
    %12 = vector.shape_cast %11 : vector<16xf32> to vector<16x1xf32>
    %cst_5 = arith.constant dense<0x7F800000> : vector<1xf32>
    %13 = vector.multi_reduction <minimumf>, %12, %cst_5 [0] : vector<16x1xf32> to vector<1xf32>
    %14 = vector.shape_cast %13 : vector<1xf32> to vector<1x1xf32>
    %cst_6 = arith.constant dense<0xFF800000> : vector<16xf32>
    %15 = vector.multi_reduction <maximumf>, %2, %cst_6 [1] : vector<16x128xf32> to vector<16xf32>
    %16 = vector.shape_cast %15 : vector<16xf32> to vector<16x1xf32>
    %cst_7 = arith.constant dense<0xFF800000> : vector<1xf32>
    %17 = vector.multi_reduction <maximumf>, %16, %cst_7 [0] : vector<16x1xf32> to vector<1xf32>
    %18 = vector.shape_cast %17 : vector<1xf32> to vector<1x1xf32>
    %c0_i32 = arith.constant 0 : i32
    %19 = arith.cmpi eq, %arg0, %c0_i32 : i32
    %20 = arith.extui %19 : i1 to i32
    %c0_i32_8 = arith.constant 0 : i32
    %21 = arith.cmpi ne, %20, %c0_i32_8 : i32
    scf.if %21 {
      %c0_13 = arith.constant 0 : index
      %c0_14 = arith.constant 0 : index
      %28 = vector.load %arg5[%c0_13, %c0_14] : memref<1x128xf32, #tpu.memory_space<vmem>>, vector<1x128xf32>
      tpu.vector_store %arg5[%c0_13, %c0_14], %10 {strides = array<i32>} : memref<1x128xf32, #tpu.memory_space<vmem>>, vector<1x128xf32>,
      %c0_15 = arith.constant 0 : index
      %c0_16 = arith.constant 0 : index
      %29 = vector.load %arg6[%c0_15, %c0_16] : memref<1x1xf32, #tpu.memory_space<vmem>>, vector<1x1xf32>
      tpu.vector_store %arg6[%c0_15, %c0_16], %14 {strides = array<i32>} : memref<1x1xf32, #tpu.memory_space<vmem>>, vector<1x1xf32>,
      %c0_17 = arith.constant 0 : index
      %c0_18 = arith.constant 0 : index
      %30 = vector.load %arg7[%c0_17, %c0_18] : memref<1x1xf32, #tpu.memory_space<vmem>>, vector<1x1xf32>
      tpu.vector_store %arg7[%c0_17, %c0_18], %18 {strides = array<i32>} : memref<1x1xf32, #tpu.memory_space<vmem>>, vector<1x1xf32>,
    } else {
    }
    %c0_i32_9 = arith.constant 0 : i32
    %22 = arith.cmpi ne, %arg0, %c0_i32_9 : i32
    %23 = arith.extui %22 : i1 to i32
    %c0_i32_10 = arith.constant 0 : i32
    %24 = arith.cmpi ne, %23, %c0_i32_10 : i32
    scf.if %24 {
      %c0_13 = arith.constant 0 : index
      %c0_14 = arith.constant 0 : index
      %28 = vector.load %arg5[%c0_13, %c0_14] : memref<1x128xf32, #tpu.memory_space<vmem>>, vector<1x128xf32>
      %29 = arith.addf %28, %10 : vector<1x128xf32>
      %c0_15 = arith.constant 0 : index
      %c0_16 = arith.constant 0 : index
      %30 = vector.load %arg5[%c0_15, %c0_16] : memref<1x128xf32, #tpu.memory_space<vmem>>, vector<1x128xf32>
      tpu.vector_store %arg5[%c0_15, %c0_16], %29 {strides = array<i32>} : memref<1x128xf32, #tpu.memory_space<vmem>>, vector<1x128xf32>,
      %c0_17 = arith.constant 0 : index
      %c0_18 = arith.constant 0 : index
      %31 = vector.load %arg6[%c0_17, %c0_18] : memref<1x1xf32, #tpu.memory_space<vmem>>, vector<1x1xf32>
      %32 = arith.minimumf %31, %14 : vector<1x1xf32>
      %c0_19 = arith.constant 0 : index
      %c0_20 = arith.constant 0 : index
      %33 = vector.load %arg6[%c0_19, %c0_20] : memref<1x1xf32, #tpu.memory_space<vmem>>, vector<1x1xf32>
      tpu.vector_store %arg6[%c0_19, %c0_20], %32 {strides = array<i32>} : memref<1x1xf32, #tpu.memory_space<vmem>>, vector<1x1xf32>,
      %c0_21 = arith.constant 0 : index
      %c0_22 = arith.constant 0 : index
      %34 = vector.load %arg7[%c0_21, %c0_22] : memref<1x1xf32, #tpu.memory_space<vmem>>, vector<1x1xf32>
      %35 = arith.maximumf %34, %18 : vector<1x1xf32>
      %c0_23 = arith.constant 0 : index
      %c0_24 = arith.constant 0 : index
      %36 = vector.load %arg7[%c0_23, %c0_24] : memref<1x1xf32, #tpu.memory_space<vmem>>, vector<1x1xf32>
      tpu.vector_store %arg7[%c0_23, %c0_24], %35 {strides = array<i32>} : memref<1x1xf32, #tpu.memory_space<vmem>>, vector<1x1xf32>,
    } else {
    }
    %c0_i32_11 = arith.constant 0 : i32
    %25 = arith.cmpi eq, %arg0, %c0_i32_11 : i32
    %26 = arith.extui %25 : i1 to i32
    %c0_i32_12 = arith.constant 0 : i32
    %27 = arith.cmpi ne, %26, %c0_i32_12 : i32
    scf.if %27 {
      %c0_13 = arith.constant 0 : index
      %c0_14 = arith.constant 0 : index
      %28 = vector.load %arg6[%c0_13, %c0_14] : memref<1x1xf32, #tpu.memory_space<vmem>>, vector<1x1xf32>
      %c0_15 = arith.constant 0 : index
      %c0_16 = arith.constant 0 : index
      %29 = vector.load %arg7[%c0_15, %c0_16] : memref<1x1xf32, #tpu.memory_space<vmem>>, vector<1x1xf32>
      %30 = arith.subf %29, %28 : vector<1x1xf32>
      %cst_17 = arith.constant 1.000000e+00 : f32
      %31 = vector.broadcast %cst_17 : f32 to vector<1x1xf32>
      %32 = arith.divf %31, %30 : vector<1x1xf32>
      %c0_18 = arith.constant 0 : index
      %c0_19 = arith.constant 0 : index
      %33 = vector.load %arg4[%c0_18, %c0_19] : memref<16x1xf32, #tpu.memory_space<vmem>>, vector<16x1xf32>
      %cst_20 = arith.constant 1.280000e+02 : f32
      %34 = vector.broadcast %cst_20 : f32 to vector<1x1xf32>
      %35 = arith.mulf %34, %28 : vector<1x1xf32>
      %36 = vector.broadcast %35 : vector<1x1xf32> to vector<16x1xf32>
      %37 = arith.subf %33, %36 : vector<16x1xf32>
      %38 = vector.broadcast %32 : vector<1x1xf32> to vector<16x1xf32>
      %39 = arith.mulf %37, %38 : vector<16x1xf32>
      %cst_21 = arith.constant 9.99999974E-5 : f32
      %40 = vector.broadcast %cst_21 : f32 to vector<16x1xf32>
      %41 = arith.addf %39, %40 : vector<16x1xf32>
      %cst_22 = arith.constant dense<0xFF800000> : vector<1xf32>
      %42 = vector.multi_reduction <maximumf>, %41, %cst_22 [0] : vector<16x1xf32> to vector<1xf32>
      %43 = vector.shape_cast %42 : vector<1xf32> to vector<1x1xf32>
      %44 = vector.broadcast %43 : vector<1x1xf32> to vector<16x1xf32>
      %45 = arith.subf %41, %44 : vector<16x1xf32>
      %46 = math.exp %45 : vector<16x1xf32>
      %cst_23 = arith.constant dense<0.000000e+00> : vector<1xf32>
      %47 = vector.multi_reduction <add>, %46, %cst_23 [0] : vector<16x1xf32> to vector<1xf32>
      %48 = vector.shape_cast %47 : vector<1xf32> to vector<1x1xf32>
      %49 = tpu.reciprocal %46 : vector<16x1xf32> -> vector<16x1xf32>
      %50 = vector.broadcast %48 : vector<1x1xf32> to vector<16x1xf32>
      %51 = arith.mulf %50, %49 : vector<16x1xf32>
      %c0_24 = arith.constant 0 : index
      %c0_25 = arith.constant 0 : index
      %52 = vector.load %arg4[%c0_24, %c0_25] : memref<16x1xf32, #tpu.memory_space<vmem>>, vector<16x1xf32>
      tpu.vector_store %arg4[%c0_24, %c0_25], %51 {strides = array<i32>} : memref<16x1xf32, #tpu.memory_space<vmem>>, vector<16x1xf32>,
      %c0_26 = arith.constant 0 : index
      %c0_27 = arith.constant 0 : index
      %53 = vector.load %arg5[%c0_26, %c0_27] : memref<1x128xf32, #tpu.memory_space<vmem>>, vector<1x128xf32>
      %cst_28 = arith.constant 1.600000e+01 : f32
      %54 = vector.broadcast %cst_28 : f32 to vector<1x1xf32>
      %55 = arith.mulf %54, %28 : vector<1x1xf32>
      %56 = vector.broadcast %55 : vector<1x1xf32> to vector<1x128xf32>
      %57 = arith.subf %53, %56 : vector<1x128xf32>
      %58 = vector.broadcast %32 : vector<1x1xf32> to vector<1x128xf32>
      %59 = arith.mulf %57, %58 : vector<1x128xf32>
      %cst_29 = arith.constant 9.99999974E-5 : f32
      %60 = vector.broadcast %cst_29 : f32 to vector<1x128xf32>
      %61 = arith.addf %59, %60 : vector<1x128xf32>
      %cst_30 = arith.constant dense<0xFF800000> : vector<1xf32>
      %62 = vector.multi_reduction <maximumf>, %61, %cst_30 [1] : vector<1x128xf32> to vector<1xf32>
      %63 = vector.shape_cast %62 : vector<1xf32> to vector<1x1xf32>
      %64 = vector.broadcast %63 : vector<1x1xf32> to vector<1x128xf32>
      %65 = arith.subf %61, %64 : vector<1x128xf32>
      %66 = math.exp %65 : vector<1x128xf32>
      %cst_31 = arith.constant dense<0.000000e+00> : vector<1xf32>
      %67 = vector.multi_reduction <add>, %66, %cst_31 [1] : vector<1x128xf32> to vector<1xf32>
      %68 = vector.shape_cast %67 : vector<1xf32> to vector<1x1xf32>
      %69 = tpu.reciprocal %66 : vector<1x128xf32> -> vector<1x128xf32>
      %70 = vector.broadcast %68 : vector<1x1xf32> to vector<1x128xf32>
      %71 = arith.mulf %70, %69 : vector<1x128xf32>
      %c0_32 = arith.constant 0 : index
      %c0_33 = arith.constant 0 : index
      %72 = vector.load %arg5[%c0_32, %c0_33] : memref<1x128xf32, #tpu.memory_space<vmem>>, vector<1x128xf32>
      tpu.vector_store %arg5[%c0_32, %c0_33], %71 {strides = array<i32>} : memref<1x128xf32, #tpu.memory_space<vmem>>, vector<1x128xf32>,
      %cst_34 = arith.constant 0.000000e+00 : f32
      %73 = vector.broadcast %cst_34 : f32 to vector<1x1xf32>
      %c0_i32_35 = arith.constant 0 : i32
      %c16_i32_36 = arith.constant 16 : i32
      %74 = arith.muli %c0_i32_35, %c16_i32_36 : i32
      %75 = tpu.assume_multiple %74, 8 : i32
      %76 = arith.index_cast %75 : i32 to index
      %c0_37 = arith.constant 0 : index
      %77 = vector.load %arg3[%76, %c0_37] : memref<16x128xf32, #tpu.memory_space<vmem>>, vector<16x128xf32>
      %78 = vector.broadcast %28 : vector<1x1xf32> to vector<16x128xf32>
      %79 = arith.subf %77, %78 : vector<16x128xf32>
      %80 = vector.broadcast %32 : vector<1x1xf32> to vector<16x128xf32>
      %81 = arith.mulf %79, %80 : vector<16x128xf32>
      %82 = arith.index_cast %75 : i32 to index
      %c0_38 = arith.constant 0 : index
      %83 = vector.load %arg4[%82, %c0_38] : memref<16x1xf32, #tpu.memory_space<vmem>>, vector<16x1xf32>
      %84 = vector.broadcast %83 : vector<16x1xf32> to vector<16x128xf32>
      %85 = arith.mulf %81, %84 : vector<16x128xf32>
      %c0_39 = arith.constant 0 : index
      %c0_40 = arith.constant 0 : index
      %86 = vector.load %arg5[%c0_39, %c0_40] : memref<1x128xf32, #tpu.memory_space<vmem>>, vector<1x128xf32>
      %87 = vector.broadcast %86 : vector<1x128xf32> to vector<16x128xf32>
      %88 = arith.mulf %85, %87 : vector<16x128xf32>
      %cst_41 = arith.constant 9.99999974E-5 : f32
      %89 = vector.broadcast %cst_41 : f32 to vector<16x128xf32>
      %90 = arith.addf %88, %89 : vector<16x128xf32>
      %91 = math.log %90 : vector<16x128xf32>
      %92 = arith.mulf %81, %91 : vector<16x128xf32>
      %cst_42 = arith.constant dense<0.000000e+00> : vector<16xf32>
      %93 = vector.multi_reduction <add>, %92, %cst_42 [1] : vector<16x128xf32> to vector<16xf32>
      %94 = vector.shape_cast %93 : vector<16xf32> to vector<16x1xf32>
      %cst_43 = arith.constant dense<0.000000e+00> : vector<1xf32>
      %95 = vector.multi_reduction <add>, %94, %cst_43 [0] : vector<16x1xf32> to vector<1xf32>
      %96 = vector.shape_cast %95 : vector<1xf32> to vector<1x1xf32>
      %97 = arith.addf %73, %96 : vector<1x1xf32>
      %c1_i32 = arith.constant 1 : i32
      %cst_44 = arith.constant 0.000000e+00 : f32
      %98 = vector.broadcast %cst_44 : f32 to vector<1x1xf32>
      %99 = arith.subf %98, %97 : vector<1x1xf32>
      %c0_45 = arith.constant 0 : index
      %c0_46 = arith.constant 0 : index
      %100 = vector.load %arg2[%c0_45, %c0_46] : memref<1x1xf32, #tpu.memory_space<vmem>>, vector<1x1xf32>
      tpu.vector_store %arg2[%c0_45, %c0_46], %99 {strides = array<i32>} : memref<1x1xf32, #tpu.memory_space<vmem>>, vector<1x1xf32>,
    } else {
    }
    return
  }
  func.func @transform_0(%arg0: i32) -> (i32, i32) {
    %c0_i32 = arith.constant 0 : i32
    %c0_i32_0 = arith.constant 0 : i32
    return %arg0, %c0_i32 : i32, i32
  }
  func.func @transform_1(%arg0: i32) -> (i32, i32) {
    %c0_i32 = arith.constant 0 : i32
    %c0_i32_0 = arith.constant 0 : i32
    %c0_i32_1 = arith.constant 0 : i32
    return %c0_i32, %c0_i32_0 : i32, i32
  }
}

</mosaic_0001>

<bundles_post_ra>
// kernel: tpu_custom_call.1
= control target key start
LH: loop header
LB: loop body
LE: loop exit
PB: predicated region body
PF: predicated region fallthrough
CT: control target
= control target key end

     0   :  { %6 = vsyncpa [#allocation8], 0  ;;  %s402_s0 = inlined_call_operand.hbm [shape: f32[16,128], index: 0, kind: input, shape index: {}]   ;;  %s403_s1 = inlined_call_operand.hbm [shape: f32[1,1], index: 1, kind: output, shape index: {}]  }
   0x1   :  { %7 = vsyncpa [#allocation9], 0  ;;  %s336_s6 = smov [#allocation7]   ;;  %s288_s10 = scalar_lea.hbm %s402_s0, 256 }
   0x2   :  { %s13_s7 = sshll.u32 %s336_s6, 4  ;;  %p289_p0 = scmp.ne.s32.totalorder %s402_s0, %s288_s10  ;;  %s14_s7 = int_to_ptr.vmem [resolvable:$true] %s13_s7 }
   0x3   :  { %p292_p1 = scmp.lt.u32.totalorder %s288_s10, %s402_s0 }
   0x5   :  { %p294_p2 = pnand %p292_p1, %p289_p0 }
   0x7   :  { %297 = shalt.err (!%p294_p2)
}
   0x8   :  { %s298_s15 = scalar_lea.vmem %s14_s7, 256  ;;  %p303_p4 = scmp.lt.s32.totalorder %s14_s7, %s14_s7 }
   0x9   :  { %p299_p3 = scmp.ne.s32.totalorder %s14_s7, %s298_s15  ;;  %p304_p5 = scmp.lt.s32.totalorder %s298_s15, %s298_s15 }
   0xb   :  { %p305_p6 = por %p304_p5, %p303_p4 }
   0xd   :  { %p306_p7 = pnand %p305_p6, %p299_p3 }
   0xf   :  { %309 = shalt.err (!%p306_p7)
}
  0x10   :  { %s337_s16 = smov 128   ;;  %s338_s17 = smov 8  }
  0x11   :  { %19 = dma.hbm_to_vmem [thread:$0]  %s402_s0, 256, %s14_s7, [#allocation8], %s337_s16, %s337_s16, %s338_s17  }
  0x12   :  { %332 = dma.done.wait [#allocation8], 256  }
  0x13   :  { %333 = vsyncadd [#allocation8], 4294967040  ;;  %v363_v0 = vld [vmem:[#allocation7] sm:$0xff]  ;;  %v365_v1 = vld [vmem:[#allocation7 + $0x8] sm:$0xff]  ;;  %v339_v9 = vmov 0   ;;  %vm71_vm0 = vcmask 0   ;;  %v100_v33 = vlaneseq }
  0x14   :  { %55 = vmax.xlane.f32.xlu1 %v363_v0  ;;  %44 = vmin.xlane.f32.xlu0 %v363_v0  ;;  %v37_v2 = vadd.f32 %v365_v1, %v363_v0  ;;  %vm169_vm1 = vcmask 1040384   ;;  %vm34_vm2 = vcmask 7168   ;;  %s340_s0 = smov [#allocation10]  }
  0x15   :  { %268 = vset.pattern.permute.xlu0 %v339_v9  ;;  %269 = vset.pattern.permute.xlu1 %v339_v9  ;;  %v101_v34 = vshrl.u32 %v100_v33, 7  ;;  %s253_s20 = sshll.u32 %s340_s0, 4  ;;  %s254_s20 = int_to_ptr.vmem [resolvable:$true] %s253_s20 }
  0x16   :  { %v38_v3 = vrot.slane %v37_v2, 4  ;;  %s310_s21 = scalar_lea.vmem %s254_s20, 16  ;;  %s314_s22 = scalar_lea.vmem %s254_s20, 32 }
  0x17   :  { %v102_v35 = vsub.s32 0, %v101_v34  ;;  %p311_p8 = scmp.ne.s32.totalorder %s254_s20, %s310_s21  ;;  %p315_p9 = scmp.lt.s32.totalorder %s254_s20, %s254_s20 }
  0x18   :  { %57 = vmax.xlane.f32.xlu1 %v365_v1  ;;  %v39_v4 = vadd.f32 %v38_v3, %v37_v2  ;;  %46 = vmin.xlane.f32.xlu0 %v365_v1  ;;  %p316_p10 = scmp.lt.s32.totalorder %s314_s22, %s310_s21 }
  0x1a   :  { %v40_v5 = vrot.slane %v39_v4, 2  ;;  %p317_p11 = por %p316_p10, %p315_p9 }
  0x1c   :  { %v41_v6 = vadd.f32 %v40_v5, %v39_v4  ;;  %p318_p12 = pnand %p317_p11, %p311_p8 }
  0x1e   :  { %v42_v7 = vrot.slane %v41_v6, 1 }
  0x20   :  { %v43_v8 = vadd.f32 %v42_v7, %v41_v6 }
  0x22   :  { %70 = vst [vmem:[#allocation4] sm:$0x1] %v43_v8 }
  0x29   :  { %v147_v39 = vld [vmem:[#allocation4] sm:$0x1] }
  0xa1   :  { %v56_v10 = vpop.xlane.xlu1 %55  ;;  %v45_v11 = vpop.xlane.xlu0 %44 }
  0xa5   :  { %v58_v12 = vpop.xlane.xlu1 %57  ;;  %v47_v13 = vpop.xlane.xlu0 %46 }
  0xa6   :  { %v59_v14 = vmax.f32 %v56_v10, %v58_v12  ;;  %v48_v15 = vmin.f32 %v45_v11, %v47_v13 }
  0xa8   :  { %v60_v16 = vrot.slane %v59_v14, 4  ;;  %v49_v17 = vrot.slane %v48_v15, 4 }
  0xaa   :  { %v61_v18 = vmax.f32 %v59_v14, %v60_v16  ;;  %v50_v19 = vmin.f32 %v48_v15, %v49_v17 }
  0xac   :  { %v62_v20 = vrot.slane %v61_v18, 2  ;;  %v51_v21 = vrot.slane %v50_v19, 2 }
  0xae   :  { %v63_v22 = vmax.f32 %v61_v18, %v62_v20  ;;  %v52_v23 = vmin.f32 %v50_v19, %v51_v21 }
  0xb0   :  { %v64_v24 = vrot.slane %v63_v22, 1  ;;  %v53_v25 = vrot.slane %v52_v23, 1 }
  0xb2   :  { %v65_v26 = vmax.f32 %v63_v22, %v64_v24  ;;  %v54_v27 = vmin.f32 %v52_v23, %v53_v25 }
  0xb4   :  { %73 = vst.msk [vmem:[#allocation6] sm:$0x1] %vm71_vm0, %v65_v26  ;;  %72 = vst.msk [vmem:[#allocation5] sm:$0x1] %vm71_vm0, %v54_v27 }
  0xbb   :  { %v91_v28 = vld [vmem:[#allocation5] sm:$0x1]  ;;  %v92_v29 = vld [vmem:[#allocation6] sm:$0x1] }
  0xbc   :  { %v148_v30 = vmul.f32 16.0, %v91_v28  ;;  %v93_v31 = vsub.f32 %v92_v29, %v91_v28  ;;  %v188_v46 = vrot.slane %v91_v28, %v102_v35  ;;  %v98_v48 = vmul.f32 128.0, %v91_v28 }
  0xbe   :  { %151 = vperm.xlu0 %268, %v148_v30   ;;  %270 = vrcp.f32 %v93_v31  ;;  %v103_v51 = vrot.slane %v98_v48, %v102_v35 }
  0xc8   :  { %v271_v32 = vpop.eup %270 }
  0xc9   :  { %160 = vperm.xlu1 %269, %v271_v32   ;;  %v111_v36 = vrot.slane %v271_v32, %v102_v35 }
  0xdd   :  { %31 = vadd.xlane.f32.xlu0 %v365_v1 }
  0xed   :  { %29 = vadd.xlane.f32.xlu1 %v363_v0 }
  0xf3   :  { %196 = vperm.xlu0 %268, %v111_v36  }
 0x13d   :  { %v152_v37 = vpop.permute.xlu0 %151 }
 0x13e   :  { %v157_v38 = vrot.slane %v152_v37, %v102_v35 }
 0x140   :  { %v158_v41 = vsub.f32 %v147_v39, %v157_v38 }
 0x148   :  { %v161_v40 = vpop.permute.xlu1 %160 }
 0x149   :  { %v166_v42 = vrot.slane %v161_v40, %v102_v35 }
 0x14b   :  { %v167_v43 = vmul.f32 %v166_v42, %v158_v41 }
 0x14d   :  { %v168_v44 = vadd.f32 0.0001, %v167_v43 }
 0x14f   :  { %v170_v45 = vsel %vm169_vm1, %v168_v44, -inf }
 0x150   :  { %171 = vmax.xlane.f32.xlu1 %v170_v45 }
 0x161   :  { %190 = vperm.xlu1 %269, %v188_v46  }
 0x16a   :  { %v32_v47 = vpop.xlane.xlu0 %31 }
 0x16b   :  { %36 = vst.msk [vmem:[#allocation3 + $0x8] sm:$0xff] %vm34_vm2, %v32_v47 }
 0x172   :  { %v97_v49 = vld [vmem:[#allocation3 + $0x8] sm:$0xff]  ;;  %v197_v39 = vpop.permute.xlu0 %196 }
 0x173   :  { %v106_v52 = vsub.f32 %v97_v49, %v103_v51 }
 0x175   :  { %v114_v53 = vmul.f32 %v111_v36, %v106_v52 }
 0x177   :  { %v116_v57 = vadd.f32 0.0001, %v114_v53 }
 0x179   :  { %v118_v60 = vsel %vm34_vm2, %v116_v57, -inf }
 0x17a   :  { %v30_v50 = vpop.xlane.xlu1 %29 }
 0x17b   :  { %35 = vst.msk [vmem:[#allocation3] sm:$0xff] %vm34_vm2, %v30_v50 }
 0x182   :  { %v96_v54 = vld [vmem:[#allocation3] sm:$0xff] }
 0x183   :  { %v105_v55 = vsub.f32 %v96_v54, %v103_v51 }
 0x185   :  { %v113_v56 = vmul.f32 %v111_v36, %v105_v55 }
 0x187   :  { %v115_v58 = vadd.f32 0.0001, %v113_v56 }
 0x189   :  { %v117_v59 = vsel %vm34_vm2, %v115_v58, -inf }
 0x18a   :  { %v119_v61 = vmax.f32 %v117_v59, %v118_v60 }
 0x18c   :  { %v120_v62 = vrot.slane %v119_v61, 4 }
 0x18e   :  { %v121_v63 = vmax.f32 %v119_v61, %v120_v62 }
 0x190   :  { %v122_v2 = vrot.slane %v121_v63, 2 }
 0x192   :  { %v123_v3 = vmax.f32 %v121_v63, %v122_v2 }
 0x194   :  { %v124_v4 = vrot.slane %v123_v3, 1 }
 0x196   :  { %v125_v5 = vmax.f32 %v123_v3, %v124_v4 }
 0x198   :  { %v126_v6 = vsub.f32 %v115_v58, %v125_v5  ;;  %v127_v7 = vsub.f32 %v116_v57, %v125_v5 }
 0x19a   :  { %v128_v8 = vmul.f32 1.442695, %v126_v6  ;;  %v130_v9 = vmul.f32 1.442695, %v127_v7 }
 0x19c   :  { %272 = vpow2.f32 %v128_v8 }
 0x19d   :  { %274 = vpow2.f32 %v130_v9 }
 0x1a6   :  { %v273_v10 = vpop.eup %272 }
 0x1a7   :  { %v275_v11 = vpop.eup %274  ;;  %v132_v12 = vsel %vm34_vm2, %v273_v10, 0.0  ;;  %276 = vrcp.f32 %v273_v10 }
 0x1a8   :  { %v133_v13 = vsel %vm34_vm2, %v275_v11, 0.0  ;;  %278 = vrcp.f32 %v275_v11 }
 0x1a9   :  { %v134_v14 = vadd.f32 %v133_v13, %v132_v12 }
 0x1ab   :  { %v135_v15 = vrot.slane %v134_v14, 4 }
 0x1ad   :  { %v136_v16 = vadd.f32 %v135_v15, %v134_v14 }
 0x1af   :  { %v137_v17 = vrot.slane %v136_v16, 2 }
 0x1b1   :  { %v138_v18 = vadd.f32 %v137_v17, %v136_v16  ;;  %v277_v20 = vpop.eup %276 }
 0x1b2   :  { %v279_v22 = vpop.eup %278 }
 0x1b3   :  { %v139_v19 = vrot.slane %v138_v18, 1 }
 0x1b5   :  { %v140_v21 = vadd.f32 %v139_v19, %v138_v18 }
 0x1b7   :  { %v143_v23 = vmul.f32 %v277_v20, %v140_v21  ;;  %v144_v24 = vmul.f32 %v279_v22, %v140_v21 }
 0x1b9   :  { %145 = vst.msk [vmem:[#allocation3] sm:$0xff] %vm34_vm2, %v143_v23  ;;  %146 = vst.msk [vmem:[#allocation3 + $0x8] sm:$0xff] %vm34_vm2, %v144_v24 }
 0x1c0   :  { %v201_v25 = vld [vmem:[#allocation3] sm:$0xff]  ;;  %v202_v31 = vld [vmem:[#allocation3 + $0x8] sm:$0xff] }
 0x1c1   :  { %205 = vperm.xlu1 %269, %v201_v25  }
 0x1dd   :  { %v172_v26 = vpop.xlane.xlu1 %171 }
 0x1de   :  { %v173_v27 = vsub.f32 %v168_v44, %v172_v26 }
 0x1e0   :  { %v174_v28 = vmul.f32 1.442695, %v173_v27 }
 0x1e1   :  { %v191_v32 = vpop.permute.xlu1 %190 }
 0x1e2   :  { %280 = vpow2.f32 %v174_v28  ;;  %v193_v37 = vsub.f32 %v363_v0, %v191_v32  ;;  %v194_v38 = vsub.f32 %v365_v1, %v191_v32 }
 0x1e4   :  { %v199_v41 = vmul.f32 %v197_v39, %v193_v37  ;;  %v200_v42 = vmul.f32 %v197_v39, %v194_v38 }
 0x1ec   :  { %v281_v29 = vpop.eup %280 }
 0x1ed   :  { %v176_v30 = vsel %vm169_vm1, %v281_v29, 0.0  ;;  %282 = vrcp.f32 %v281_v29 }
 0x1ee   :  { %177 = vadd.xlane.f32.xlu1 %v176_v30 }
 0x1f7   :  { %v283_v34 = vpop.eup %282 }
 0x1ff   :  { %210 = vperm.xlu1 %269, %v202_v31  }
 0x240   :  { %v206_v33 = vpop.permute.xlu1 %205 }
 0x241   :  { %v213_v43 = vmul.f32 %v206_v33, %v199_v41 }
 0x27b   :  { %v178_v35 = vpop.xlane.xlu1 %177 }
 0x27c   :  { %v180_v36 = vmul.f32 %v283_v34, %v178_v35 }
 0x27e   :  { %181 = vst [vmem:[#allocation4] sm:$0x1] %v180_v36 }
 0x27f   :  { %v211_v40 = vpop.permute.xlu1 %210 }
 0x280   :  { %v214_v44 = vmul.f32 %v211_v40, %v200_v42 }
 0x285   :  { %v262_v45 = vld [vmem:[#allocation4] ss:$0 sm:$0xff] }
 0x286   :  { %v222_v46 = vmul.f32 %v262_v45, %v213_v43  ;;  %v223_v47 = vmul.f32 %v262_v45, %v214_v44 }
 0x288   :  { %v224_v48 = vadd.f32 0.0001, %v222_v46  ;;  %v225_v49 = vadd.f32 0.0001, %v223_v47 }
 0x28a   :  { %284 = vlog2.f32 %v224_v48 }
 0x28b   :  { %286 = vlog2.f32 %v225_v49 }
 0x294   :  { %v285_v50 = vpop.eup %284 }
 0x295   :  { %v287_v51 = vpop.eup %286  ;;  %v227_v52 = vmul.f32 0.6931472, %v285_v50 }
 0x296   :  { %v229_v0 = vmul.f32 0.6931472, %v287_v51 }
 0x297   :  { %v230_v53 = vmul.f32 %v227_v52, %v199_v41 }
 0x298   :  { %v231_v1 = vmul.f32 %v229_v0, %v200_v42 }
 0x299   :  { %232 = vadd.xlane.f32.xlu1 %v230_v53 }
 0x29a   :  { %234 = vadd.xlane.f32.xlu0 %v231_v1 }
 0x326   :  { %v233_v54 = vpop.xlane.xlu1 %232 }
 0x327   :  { %v235_v55 = vpop.xlane.xlu0 %234 }
 0x328   :  { %v236_v56 = vadd.f32 %v235_v55, %v233_v54 }
 0x32a   :  { %v237_v57 = vrot.slane %v236_v56, 4 }
 0x32c   :  { %v238_v58 = vadd.f32 %v237_v57, %v236_v56 }
 0x32e   :  { %v239_v59 = vrot.slane %v238_v58, 2 }
 0x330   :  { %v240_v60 = vadd.f32 %v239_v59, %v238_v58 }
 0x332   :  { %v241_v61 = vrot.slane %v240_v60, 1 }
 0x334   :  { %v242_v62 = vadd.f32 %v241_v61, %v240_v60 }
 0x336   :  { %v244_v63 = vsub.f32 0.0, %v242_v62 }
 0x338   :  { %246 = vst.msk [vmem:[#allocation10] sm:$0x1] %vm71_vm0, %v244_v63 }
 0x339   :  { %321 = shalt.err (!%p318_p12)
}
 0x33a   :  { %s322_s25 = scalar_lea.hbm %s403_s1, 16 }
 0x33b   :  { %p323_p13 = scmp.ne.s32.totalorder %s403_s1, %s322_s25  ;;  %p326_p0 = scmp.lt.u32.totalorder %s322_s25, %s403_s1 }
 0x33d   :  { %p328_p1 = pnand %p326_p0, %p323_p13 }
 0x33f   :  { %331 = shalt.err (!%p328_p1)
}
 0x340   :  { %256 = dma.vmem_to_hbm [thread:$0]  %s254_s20, 16, %s403_s1, [#allocation9]  }
 0x341   :  { %334 = dma.done.wait [#allocation9], 16  }
 0x342   :  { %335 = vsyncadd [#allocation9], 4294967280 }
 0x343   :  { %260 = vsyncpa [#allocation8], 1 }
 0x344   :  { %261 = vsyncpa [#allocation9], 1 }

</bundles_post_ra>
